<compile_context>
chip_gen: v7x
topology: tpu7x:2x2x1
jax: 0.10.0
libtpu: 0.0.40
codegen_flags: <defaults>
</compile_context>

<pallas_src>
import jax
import jax.numpy as jnp
from jax.experimental import pallas as pl
from jax.experimental.pallas import tpu as pltpu


def _round_up(n, m):
    return ((n + m - 1) // m) * m


def _ffn_kernel(x_ref, w1_ref, b1_ref, w2_ref, b2_ref, o_ref, acc_ref):
    """One (row-tile, hidden-tile) step of y = relu(x @ W1 + b1) @ W2 + b2."""
    k = pl.program_id(1)

    @pl.when(k == 0)
    def _():
        acc_ref[...] = jnp.zeros_like(acc_ref)

    # (bm, D) @ (D, bh) -> (bm, bh); bias + ReLU on this hidden slice.
    h = jnp.dot(x_ref[...], w1_ref[...], preferred_element_type=jnp.float32)
    h = jnp.maximum(h + b1_ref[...], 0.0)

    # (bm, bh) @ (bh, D) -> accumulate partial second projection in f32.
    acc_ref[...] += jnp.dot(h.astype(w2_ref.dtype), w2_ref[...],
                            preferred_element_type=jnp.float32)

    @pl.when(k == pl.num_programs(1) - 1)
    def _():
        o_ref[...] = (acc_ref[...] + b2_ref[...]).astype(o_ref.dtype)


def position_wise_ffn(x, w1, b1, w2, b2, *, block_rows=256, block_hidden=256):
    """PositionWiseFFN.forward.  x: (..., D); w1: (D, H); w2: (H, D)."""
    orig_shape = x.shape
    D = orig_shape[-1]
    H = w1.shape[1]
    assert w1.shape == (D, H) and w2.shape == (H, D)
    assert b1.shape == (H,) and b2.shape == (D,)

    # Flatten all leading dims into one big row axis (lane dim stays D).
    x2 = x.reshape(-1, D)
    M = x2.shape[0]

    # Row tile: multiple of 8 sublanes; pad rows if M doesn't divide evenly.
    bm = min(block_rows, _round_up(M, 8))
    Mp = _round_up(M, bm)
    if Mp != M:
        x2 = jnp.pad(x2, ((0, Mp - M), (0, 0)))

    # Hidden tile (contraction dim of the second matmul); fall back to the
    # full H if it doesn't divide evenly.
    bh = block_hidden if (H % block_hidden == 0) else H

    b1 = b1.reshape(1, H)
    b2 = b2.reshape(1, D)

    grid = (Mp // bm, H // bh)

    out = pl.pallas_call(
        _ffn_kernel,
        out_shape=jax.ShapeDtypeStruct((Mp, D), x.dtype),
        grid=grid,
        in_specs=[
            pl.BlockSpec((bm, D), lambda i, k: (i, 0)),   # x row tile
            pl.BlockSpec((D, bh), lambda i, k: (0, k)),   # W1 hidden slice
            pl.BlockSpec((1, bh), lambda i, k: (0, k)),   # b1 hidden slice
            pl.BlockSpec((bh, D), lambda i, k: (k, 0)),   # W2 hidden slice
            pl.BlockSpec((1, D), lambda i, k: (0, 0)),    # b2 (resident)
        ],
        out_specs=pl.BlockSpec((bm, D), lambda i, k: (i, 0)),
        scratch_shapes=[pltpu.VMEM((bm, D), jnp.float32)],
        compiler_params=pltpu.CompilerParams(
            dimension_semantics=("parallel", "arbitrary")),
    )(x2, w1, b1, w2, b2)

    if Mp != M:
        out = out[:M]
    return out.reshape(orig_shape)


if __name__ == "__main__":
    # Small but TPU-friendly shapes: lane-dense model dim D = 128.
    B, S, D = 2, 8, 128
    EXPAND = 4.0
    H = int(D * EXPAND)

    key = jax.random.PRNGKey(0)
    kx, k1, kb1, k2, kb2 = jax.random.split(key, 5)
    x = jax.random.normal(kx, (B, S, D), jnp.float32)

    # nn.Linear params, weights pre-transposed to (in, out).
    w1 = jax.random.normal(k1, (D, H), jnp.float32) * 0.02
    b1 = jax.random.normal(kb1, (H,), jnp.float32) * 0.02
    w2 = jax.random.normal(k2, (H, D), jnp.float32) * 0.02
    b2 = jax.random.normal(kb2, (D,), jnp.float32) * 0.02

    # TODO(synk): self.norm1 = nn.BatchNorm1d(hidden_dim) is defined in the
    # PyTorch module but never applied in forward(), so it is omitted here.

    out = position_wise_ffn(x, w1, b1, w2, b2,
                            block_rows=256, block_hidden=256)
    out = jax.block_until_ready(out)

    # Pure-JAX reference check.
    ref = jnp.dot(jnp.maximum(jnp.dot(x, w1) + b1, 0.0), w2) + b2

    assert out.shape == x.shape and out.dtype == jnp.float32
    assert bool(jnp.all(jnp.isfinite(out)))
    assert bool(jnp.allclose(out, ref, rtol=1e-4, atol=1e-4))
    print("KERNEL_OK")
</pallas_src>

<mosaic_0001>
module attributes {stable_mosaic.version = 11 : i64} {
  func.func @_ffn_kernel(%arg0: i32, %arg1: i32, %arg2: memref<16x128xf32, #tpu.memory_space<vmem>>, %arg3: memref<128x256xf32, #tpu.memory_space<vmem>>, %arg4: memref<1x256xf32, #tpu.memory_space<vmem>>, %arg5: memref<256x128xf32, #tpu.memory_space<vmem>>, %arg6: memref<1x128xf32, #tpu.memory_space<vmem>>, %arg7: memref<16x128xf32, #tpu.memory_space<vmem>>, %arg8: memref<16x128xf32, #tpu.memory_space<vmem>>) attributes {dimension_semantics = [#tpu.dimension_semantics<parallel>, #tpu.dimension_semantics<arbitrary>], iteration_bounds = array<i64: 1, 2>, scalar_prefetch = 0 : i64, scratch_operands = 1 : i64, tpu.core_type = #tpu.core_type<tc>, window_params = [{transform_indices = @transform_0, window_bounds = array<i64: 16, 128>}, {transform_indices = @transform_1, window_bounds = array<i64: 128, 256>}, {transform_indices = @transform_2, window_bounds = array<i64: 1, 256>}, {transform_indices = @transform_3, window_bounds = array<i64: 256, 128>}, {pipeline_mode = #tpu.pipeline_mode<synchronous>, transform_indices = @transform_4, window_bounds = array<i64: 1, 128>}, {transform_indices = @transform_5, window_bounds = array<i64: 16, 128>}]} {
    %c0_i32 = arith.constant 0 : i32
    %0 = arith.cmpi eq, %arg1, %c0_i32 : i32
    %1 = arith.extui %0 : i1 to i32
    %c0_i32_0 = arith.constant 0 : i32
    %2 = arith.cmpi ne, %1, %c0_i32_0 : i32
    scf.if %2 {
      %cst_15 = arith.constant 0.000000e+00 : f32
      %19 = vector.broadcast %cst_15 : f32 to vector<16x128xf32>
      %c0_16 = arith.constant 0 : index
      %c0_17 = arith.constant 0 : index
      %20 = vector.load %arg8[%c0_16, %c0_17] : memref<16x128xf32, #tpu.memory_space<vmem>>, vector<16x128xf32>
      tpu.vector_store %arg8[%c0_16, %c0_17], %19 {strides = array<i32>} : memref<16x128xf32, #tpu.memory_space<vmem>>, vector<16x128xf32>,
    } else {
    }
    %c0 = arith.constant 0 : index
    %c0_1 = arith.constant 0 : index
    %3 = vector.load %arg2[%c0, %c0_1] : memref<16x128xf32, #tpu.memory_space<vmem>>, vector<16x128xf32>
    %c0_2 = arith.constant 0 : index
    %c0_3 = arith.constant 0 : index
    %4 = vector.load %arg3[%c0_2, %c0_3] : memref<128x256xf32, #tpu.memory_space<vmem>>, vector<128x256xf32>
    %cst = arith.constant dense<0.000000e+00> : vector<16x256xf32>
    %5 = tpu.matmul %3, %4, %cst {dimension_numbers = #tpu.dot_dimension_numbers<[1], [0], [0], [1], [0, 0, 1, 1], [], []>} : vector<16x128xf32>, vector<128x256xf32>, vector<16x256xf32> -> vector<16x256xf32>
    %c0_4 = arith.constant 0 : index
    %c0_5 = arith.constant 0 : index
    %6 = vector.load %arg4[%c0_4, %c0_5] : memref<1x256xf32, #tpu.memory_space<vmem>>, vector<1x256xf32>
    %7 = vector.broadcast %6 : vector<1x256xf32> to vector<16x256xf32>
    %8 = arith.addf %5, %7 : vector<16x256xf32>
    %cst_6 = arith.constant 0.000000e+00 : f32
    %9 = vector.broadcast %cst_6 : f32 to vector<16x256xf32>
    %10 = arith.maximumf %8, %9 : vector<16x256xf32>
    %c0_7 = arith.constant 0 : index
    %c0_8 = arith.constant 0 : index
    %11 = vector.load %arg8[%c0_7, %c0_8] : memref<16x128xf32, #tpu.memory_space<vmem>>, vector<16x128xf32>
    %c0_9 = arith.constant 0 : index
    %c0_10 = arith.constant 0 : index
    %12 = vector.load %arg5[%c0_9, %c0_10] : memref<256x128xf32, #tpu.memory_space<vmem>>, vector<256x128xf32>
    %cst_11 = arith.constant dense<0.000000e+00> : vector<16x128xf32>
    %13 = tpu.matmul %10, %12, %cst_11 {dimension_numbers = #tpu.dot_dimension_numbers<[1], [0], [0], [1], [0, 0, 1, 1], [], []>} : vector<16x256xf32>, vector<256x128xf32>, vector<16x128xf32> -> vector<16x128xf32>
    %14 = arith.addf %11, %13 : vector<16x128xf32>
    %c0_12 = arith.constant 0 : index
    %c0_13 = arith.constant 0 : index
    %15 = vector.load %arg8[%c0_12, %c0_13] : memref<16x128xf32, #tpu.memory_space<vmem>>, vector<16x128xf32>
    tpu.vector_store %arg8[%c0_12, %c0_13], %14 {strides = array<i32>} : memref<16x128xf32, #tpu.memory_space<vmem>>, vector<16x128xf32>,
    %c1_i32 = arith.constant 1 : i32
    %16 = arith.cmpi eq, %arg1, %c1_i32 : i32
    %17 = arith.extui %16 : i1 to i32
    %c0_i32_14 = arith.constant 0 : i32
    %18 = arith.cmpi ne, %17, %c0_i32_14 : i32
    scf.if %18 {
      %c0_15 = arith.constant 0 : index
      %c0_16 = arith.constant 0 : index
      %19 = vector.load %arg8[%c0_15, %c0_16] : memref<16x128xf32, #tpu.memory_space<vmem>>, vector<16x128xf32>
      %c0_17 = arith.constant 0 : index
      %c0_18 = arith.constant 0 : index
      %20 = vector.load %arg6[%c0_17, %c0_18] : memref<1x128xf32, #tpu.memory_space<vmem>>, vector<1x128xf32>
      %21 = vector.broadcast %20 : vector<1x128xf32> to vector<16x128xf32>
      %22 = arith.addf %19, %21 : vector<16x128xf32>
      %c0_19 = arith.constant 0 : index
      %c0_20 = arith.constant 0 : index
      %23 = vector.load %arg7[%c0_19, %c0_20] : memref<16x128xf32, #tpu.memory_space<vmem>>, vector<16x128xf32>
      tpu.vector_store %arg7[%c0_19, %c0_20], %22 {strides = array<i32>} : memref<16x128xf32, #tpu.memory_space<vmem>>, vector<16x128xf32>,
    } else {
    }
    return
  }
  func.func @transform_0(%arg0: i32, %arg1: i32) -> (i32, i32) {
    %c0_i32 = arith.constant 0 : i32
    %c0_i32_0 = arith.constant 0 : i32
    return %arg0, %c0_i32 : i32, i32
  }
  func.func @transform_1(%arg0: i32, %arg1: i32) -> (i32, i32) {
    %c0_i32 = arith.constant 0 : i32
    %c0_i32_0 = arith.constant 0 : i32
    return %c0_i32, %arg1 : i32, i32
  }
  func.func @transform_2(%arg0: i32, %arg1: i32) -> (i32, i32) {
    %c0_i32 = arith.constant 0 : i32
    %c0_i32_0 = arith.constant 0 : i32
    return %c0_i32, %arg1 : i32, i32
  }
  func.func @transform_3(%arg0: i32, %arg1: i32) -> (i32, i32) {
    %c0_i32 = arith.constant 0 : i32
    %c0_i32_0 = arith.constant 0 : i32
    return %arg1, %c0_i32 : i32, i32
  }
  func.func @transform_4(%arg0: i32, %arg1: i32) -> (i32, i32) {
    %c0_i32 = arith.constant 0 : i32
    %c0_i32_0 = arith.constant 0 : i32
    %c0_i32_1 = arith.constant 0 : i32
    return %c0_i32, %c0_i32_0 : i32, i32
  }
  func.func @transform_5(%arg0: i32, %arg1: i32) -> (i32, i32) {
    %c0_i32 = arith.constant 0 : i32
    %c0_i32_0 = arith.constant 0 : i32
    return %arg0, %c0_i32 : i32, i32
  }
}

</mosaic_0001>

<bundles_post_ra>
// kernel: tpu_custom_call.1
= control target key start
LH: loop header
LB: loop body
LE: loop exit
PB: predicated region body
PF: predicated region fallthrough
CT: control target
= control target key end

     0   :  { %s1456_s0 = inlined_call_operand.hbm [shape: f32[16,128], index: 0, kind: input, shape index: {}]   ;;  %s1457_s1 = inlined_call_operand.hbm [shape: f32[128,512], index: 1, kind: input, shape index: {}]   ;;  %s1458_s2 = inlined_call_operand.vmem [shape: f32[1,512], index: 2, kind: input, shape index: {}]   ;;  %s1459_s3 = inlined_call_operand.hbm [shape: f32[512,128], index: 3, kind: input, shape index: {}]   ;;  %s1460_s4 = inlined_call_operand.vmem [shape: f32[1,128], index: 4, kind: input, shape index: {}]   ;;  %s1461_s5 = inlined_call_operand.hbm [shape: f32[16,128], index: 5, kind: output, shape index: {}]  }
   0x1   :  { %1468 = sst [smem:[#allocation13_spill]] %s1457_s1 }
   0x2   :  { %10 = vsyncpa [#allocation4], 0 }
   0x3   :  { %11 = vsyncpa [#allocation7], 0 }
   0x4   :  { %13 = vsyncpa [#allocation7 + $0x1], 0 }
   0x5   :  { %14 = vsyncpa [#allocation5], 0  ;;  %s1140_s18 = smov 0   ;;  %s1142_s19 = smov 0  }
   0x6   :  { %s1144_s20 = smov 0   ;;  %s1146_s21 = smov 0  }
   0x7   :  { %s1148_s22 = smov 0   ;;  %s1150_s23 = smov 0  }
   0x8 LB: > { %s29_s24 = sadd.s32 1, %s1091_s22  ;;  %s65_s25 = sadd.s32 1, %s1083_s20  ;;  %s1095_s23 = sphi %s1150_s23, %s20_s23   ;;  %s1091_s22 = sphi %s1148_s22, %s1485_s22   ;;  %s1087_s21 = sphi %s1146_s21, %s1484_s21   ;;  %s1083_s20 = sphi %s1144_s20, %s1483_s20   ;;  %s1079_s19 = sphi %s1142_s19, %s1482_s19   ;;  %s1075_s18 = sphi %s1140_s18, %s1481_s18  }
   0x9   : > { %p30_p0 = scmp.ge.s32.totalorder %s29_s24, 2  ;;  %p72_p1 = scmp.ne.s32.totalorder %s1083_s20, %s1079_s19 }
   0xa   : > { %p73_p2 = scmp.eq.s32.totalorder %s1095_s23, 0  ;;  %p860_p4 = scmp.lt.s32.totalorder %s1095_s23, 2 }
   0xb   : > { %s1487_s24 = smov (%p30_p0, %s29_s24), 0  ;;  %s220_s27 = sand.u32 1, %s1095_s23  }
   0xc   : > { %p74_p3 = por %p73_p2, %p72_p1  ;;  %s62_s26 = ssub.s32 %s1091_s22, %s1487_s24 }
   0xd   : > { %p63_p5 = scmp.eq.s32.totalorder %s62_s26, 0  ;;  %s222_s28 = sand.u32 1, %s1083_s20  }
   0xe   : > { %s732_s29 = sshll.u32 %s1091_s22, 8  ;;  %s1186_s6 = sshll.u32 %s222_s28, 8 }
   0xf   : > { %s1184_s30 = scalar_select %p63_p5, %s1083_s20, %s65_s25  }
  0x10   : > { %s1469_s1 = sld [smem:[#allocation13_spill]]  ;;  %p1193_p6 = pnand %p860_p4, %p74_p3 }
  0x11   : > { %s224_s11 = scalar_lea.vmem [#allocation6], %s1186_s6  ;;  %s1200_s13 = scalar_lea.sflag [#allocation7], %s220_s27 }
  0x12   : > { %s1470_s10 = scalar_select %p1193_p6, 1, 0 }
  0x13   : > { %s231_s12 = sshll.u32 %s224_s11, 4  ;;  %p1463_p8 = pneg %p1193_p6  ;;  %s1198_s12 = int_to_ptr.vmem [resolvable:$true] %s231_s12 }
  0x16   : > { %s1191_s9 = scalar_lea.hbm %s1469_s1, %s732_s29  ;;  %s928_s17 = scalar_lea.hbm %s1469_s1, 8192 }
  0x17   : > { %s923_s14 = scalar_lea.hbm %s1191_s9, 4096  ;;  %p929_p11 = scmp.lt.u32.totalorder %s1191_s9, %s1469_s1 }
  0x18   : > { %p924_p7 = scmp.ne.s32.totalorder %s1191_s9, %s923_s14  ;;  %p930_p12 = scmp.lt.u32.totalorder %s928_s17, %s923_s14 }
  0x19   : > { %p932_p0 = scmp.lt.u32.totalorder %s923_s14, %s1191_s9 }
  0x1a   : > { %p926_p9 = pnand %p1463_p8, %p924_p7  ;;  %p931_p13 = por %p930_p12, %p929_p11 }
  0x1c   : > { %p927_p10 = pneg %p926_p9  ;;  %p933_p1 = por %p932_p0, %p931_p13 }
  0x1e   : > { %p934_p2 = pnand %p933_p1, %p927_p10 }
  0x20   : > { %937 = shalt.err (!%p934_p2)
}
  0x21   : > { %s938_s27 = scalar_lea.vmem %s1198_s12, 4096  ;;  %s1097_s28 = smov [#allocation6]  }
  0x22   : > { %p939_p3 = scmp.ne.s32.totalorder %s1198_s12, %s938_s27  ;;  %s943_s29 = sshll.u32 %s1097_s28, 4  ;;  %s944_s29 = int_to_ptr.vmem [resolvable:$false] %s943_s29 }
  0x23   : > { %s945_s7 = scalar_lea.vmem %s944_s29, 8192  ;;  %p946_p7 = scmp.lt.s32.totalorder %s1198_s12, %s944_s29 }
  0x24   : > { %p941_p4 = pnand %p939_p3, %p1463_p8  ;;  %p947_p9 = scmp.lt.s32.totalorder %s945_s7, %s938_s27 }
  0x26   : > { %p942_p5 = pneg %p941_p4  ;;  %p948_p11 = por %p947_p9, %p946_p7 }
  0x28   : > { %p949_p12 = pnand %p948_p11, %p942_p5 }
  0x2a   : > { %952 = shalt.err (!%p949_p12)
}
  0x2b   : > { %s1098_s8 = smov 512   ;;  %s1099_s11 = smov 256  }
  0x2c   : > { %s1100_s14 = smov 16   ;;  %s1229_s15 = sadd.s32 4294967295, %s1095_s23  }
  0x2d   : > { %855 = dma.hbm_to_vmem [thread:$0]  (!%p1193_p6), %s1191_s9, 4096, %s1198_s12, %s1200_s13, %s1098_s8, %s1099_s11, %s1100_s14  }
  0x2e   : > { %p78_p10 = scmp.ne.s32.totalorder %s1079_s19, %s1075_s18  ;;  %p1462_p13 = scmp.eq.s32.totalorder %s1229_s15, 0 }
  0x2f   : > { %p711_p0 = scmp.ge.s32.totalorder %s1095_s23, 1  ;;  %p188_p1 = scmp.lt.s32.totalorder %s1095_s23, 3 }
  0x30   : > { %p1238_p2 = por %p1462_p13, %p78_p10  ;;  %s1101_s9 = smov [#allocation3]  }
  0x31   : > { %p1242_p3 = pnand %p711_p0, %p188_p1  ;;  %s203_s12 = sshll.u32 %s1101_s9, 4  ;;  %s1246_s12 = int_to_ptr.vmem [resolvable:$true] %s203_s12 }
  0x32   : > { %s1471_s16 = scalar_select %p1238_p2, 1, 0 }
  0x33   : > { %s1472_s17 = scalar_select %p1242_p3, 1, 0 }
  0x34   : > { %p848_p4 = pneg %p1242_p3  ;;  %s733_s18 = sshll.u32 %s1091_s22, 12 }
  0x35   : > { %s1260_s28 = scalar_lea.hbm %s1459_s3, %s733_s18  ;;  %s253_s29 = scalar_lea.vmem [#allocation8], %s1186_s6 }
  0x36   : > { %p1253_p5 = pnand %p848_p4, %p1462_p13  ;;  %s260_s7 = sshll.u32 %s253_s29, 4  ;;  %s1263_s7 = int_to_ptr.vmem [resolvable:$true] %s260_s7 }
  0x37   : > { %s953_s14 = scalar_lea.hbm %s1456_s0, 256 }
  0x38   : > { %p954_p7 = scmp.ne.s32.totalorder %s1456_s0, %s953_s14  ;;  %p955_p9 = pneg %p1253_p5 }
  0x39   : > { %p960_p10 = scmp.lt.u32.totalorder %s953_s14, %s1456_s0 }
  0x3a   : > { %p956_p11 = pnand %p955_p9, %p954_p7 }
  0x3c   : > { %p957_p12 = pneg %p956_p11 }
  0x3e   : > { %p962_p0 = pnand %p960_p10, %p957_p12 }
  0x40   : > { %965 = shalt.err (!%p962_p0)
}
  0x41   : > { %s966_s6 = scalar_lea.vmem %s1246_s12, 256  ;;  %p974_p8 = scmp.lt.s32.totalorder %s1246_s12, %s1246_s12 }
  0x42   : > { %p967_p1 = scmp.ne.s32.totalorder %s1246_s12, %s966_s6  ;;  %p975_p2 = scmp.lt.s32.totalorder %s966_s6, %s966_s6 }
  0x44   : > { %p969_p4 = pnand %p967_p1, %p955_p9  ;;  %p976_p3 = por %p975_p2, %p974_p8 }
  0x46   : > { %p970_p13 = pneg %p969_p4 }
  0x48   : > { %p977_p6 = pnand %p976_p3, %p970_p13 }
  0x4a   : > { %980 = shalt.err (!%p977_p6)
}
  0x4b   : > { %s1102_s1 = smov 128   ;;  %s1103_s18 = smov 8  }
  0x4c   : > { %851 = dma.hbm_to_vmem [thread:$0]  (!%p1253_p5), %s1456_s0, 256, %s1246_s12, [#allocation4], %s1102_s1, %s1102_s1, %s1103_s18  }
  0x4d   : > { %s981_s11 = scalar_lea.hbm %s1260_s28, 4096  ;;  %p1474_p6 = scmp.ne.s32.totalorder %s1470_s10, 0 }
  0x4e   : > { %p982_p8 = scmp.ne.s32.totalorder %s1260_s28, %s981_s11  ;;  %s986_s26 = scalar_lea.hbm %s1459_s3, 8192 }
  0x4f   : > { %p1475_p13 = pneg %p1474_p6  ;;  %p987_p7 = scmp.lt.u32.totalorder %s1260_s28, %s1459_s3 }
  0x50   : > { %p988_p9 = scmp.lt.u32.totalorder %s986_s26, %s981_s11  ;;  %p990_p12 = scmp.lt.u32.totalorder %s981_s11, %s1260_s28 }
  0x51   : > { %p984_p2 = pnand %p982_p8, %p1475_p13 }
  0x52   : > { %p989_p11 = por %p988_p9, %p987_p7 }
  0x53   : > { %p985_p3 = pneg %p984_p2 }
  0x54   : > { %p991_p10 = por %p990_p12, %p989_p11 }
  0x56   : > { %p992_p0 = pnand %p991_p10, %p985_p3 }
  0x58   : > { %995 = shalt.err (!%p992_p0)
}
  0x59   : > { %s996_s12 = scalar_lea.vmem %s1263_s7, 4096  ;;  %p1476_p1 = pmov %p1475_p13 }
  0x5a   : > { %p997_p5 = scmp.ne.s32.totalorder %s1263_s7, %s996_s12  ;;  %s1104_s25 = smov [#allocation8]  }
  0x5b   : > { %s1001_s29 = sshll.u32 %s1104_s25, 4  ;;  %s1002_s29 = int_to_ptr.vmem [resolvable:$false] %s1001_s29 }
  0x5c   : > { %p999_p4 = pnand %p997_p5, %p1476_p1  ;;  %s1003_s8 = scalar_lea.vmem %s1002_s29, 8192 }
  0x5d   : > { %p1004_p13 = scmp.lt.s32.totalorder %s1263_s7, %s1002_s29  ;;  %p1005_p2 = scmp.lt.s32.totalorder %s1003_s8, %s996_s12 }
  0x5e   : > { %p1000_p8 = pneg %p999_p4 }
  0x5f   : > { %p1006_p7 = por %p1005_p2, %p1004_p13 }
  0x61   : > { %p1007_p9 = pnand %p1006_p7, %p1000_p8 }
  0x63   : > { %1010 = shalt.err (!%p1007_p9)
}
  0x64   : > { %858 = dma.hbm_to_vmem [thread:$0]  (!%p1474_p6), %s1260_s28, 4096, %s1263_s7, %s1200_s13, %s1102_s1, %s1102_s1, %s1103_s18  }
  0x65   : > { %p1477_p3 = scmp.ne.s32.totalorder %s1472_s17, 0 }
  0x66   : > { %p1478_p11 = scmp.eq.s32.totalorder (!%p1477_p3), %s1229_s15, 0 }
  0x67   : > { %272 = sbr.rel (%p1477_p3) target bundleno = 637 (0x27d), region = 40 }
  0x6e   : > { %1062 = dma.done.wait (%p1478_p11), [#allocation4], 256   ;;  %p1479_p12 = pmov %p1478_p11 }
  0x6f   : > { %s278_s10 = sand.u32 1, %s1229_s15   ;;  %s280_s11 = sand.u32 1, %s1079_s19  }
  0x70   : > { %1064 = vsyncadd (%p1479_p12), [#allocation4], 4294967040  ;;  %s722_s14 = sshll.u32 %s280_s11, 8  ;;  %s279_s9 = scalar_lea.sflag [#allocation7], %s278_s10 }
  0x71   : > { %s1324_s26 = scalar_lea.vmem [#allocation6], %s722_s14  ;;  %p1480_p10 = scmp.ne.s32.totalorder %s1471_s16, 0 }
  0x73   : > { %1066 = dma.done.wait (%p1480_p10), %s279_s9, 8192  }
  0x74   : > { %1068 = vsyncadd (%p1480_p10), %s279_s9, 4294959104  ;;  %s724_s13 = sshll.u32 %s1087_s21, 1  ;;  %s1337_s1 = scalar_lea.vmem [#allocation8], %s722_s14 }
  0x75   : > { %p325_p6 = scmp.lt.s32.totalorder %s724_s13, 3  ;;  %p725_p0 = scmp.ne.s32.totalorder %s1087_s21, 0 }
  0x76   : > { %v1105_v0 = vmov (!%p725_p0), 0.0  }
  0x77   : > { %s1489_s13 = smov (!%p325_p6, %s724_s13), 3  ;;  %334 = sbr.rel (%p725_p0) target bundleno = 126 (0x7e), region = 56 }
  0x78   : > { %s327_s7 = scalar_lea.vmem %s1458_s2, %s1489_s13  ;;  %335 = vst [vmem:[#allocation2] sm:$0xff] (!%p725_p0), %v1105_v0  ;;  %336 = vst [vmem:[#allocation2 + $0x8] sm:$0xff] (!%p725_p0), %v1105_v0 }
  0x7e PF: > { %v340_v1 = vld [vmem:[%s1324_s26 + $0x8] sm:$0xff]  ;;  %v342_v2 = vld [vmem:[%s1324_s26 + $0x18] sm:$0xff]  ;;  %v339_v3 = vld [vmem:[%s1324_s26] sm:$0xff]  ;;  %v1106_v8 = vmov 0.0   ;;  %p726_p5 = scmp.ne.s32.totalorder %s1087_s21, 1 }
  0x7f   : > { %v772_v4 = vpack.c.bf16 %v342_v2, %v340_v1  ;;  %v341_v5 = vld [vmem:[%s1324_s26 + $0x10] sm:$0xff]  ;;  %v344_v6 = vld [vmem:[%s1324_s26 + $0x28] sm:$0xff]  ;;  %v346_v7 = vld [vmem:[%s1324_s26 + $0x38] sm:$0xff]  ;;  %447 = vmatprep.mubr.f32.mxu0 %v1106_v8 }
  0x80   : > { %v774_v9 = vpack.c.bf16 %v341_v5, %v339_v3  ;;  %v776_v10 = vpack.c.bf16 %v346_v7, %v344_v6  ;;  %v343_v11 = vld [vmem:[%s1324_s26 + $0x20] sm:$0xff]  ;;  %v345_v12 = vld [vmem:[%s1324_s26 + $0x30] sm:$0xff]  ;;  %v348_v13 = vld [vmem:[%s1324_s26 + $0x48] sm:$0xff] }
  0x81   : > { %773 = vmatprep.subr.bf16.mxu0 %v772_v4  ;;  %v350_v14 = vld [vmem:[%s1324_s26 + $0x58] sm:$0xff]  ;;  %v778_v15 = vpack.c.bf16 %v345_v12, %v343_v11  ;;  %v347_v17 = vld [vmem:[%s1324_s26 + $0x40] sm:$0xff]  ;;  %v349_v18 = vld [vmem:[%s1324_s26 + $0x50] sm:$0xff] }
  0x82   : > { %775 = vmatpush1.bf16.msra.mxu0 %v774_v9  ;;  %v780_v16 = vpack.c.bf16 %v350_v14, %v348_v13  ;;  %v352_v19 = vld [vmem:[%s1324_s26 + $0x68] sm:$0xff]  ;;  %v354_v20 = vld [vmem:[%s1324_s26 + $0x78] sm:$0xff]  ;;  %v782_v21 = vpack.c.bf16 %v349_v18, %v347_v17  ;;  %v351_v23 = vld [vmem:[%s1324_s26 + $0x60] sm:$0xff] }
  0x83   : > { %777 = vmatprep.subr.bf16.mxu0 %v776_v10  ;;  %v784_v22 = vpack.c.bf16 %v354_v20, %v352_v19  ;;  %v353_v24 = vld [vmem:[%s1324_s26 + $0x70] sm:$0xff]  ;;  %v356_v25 = vld [vmem:[%s1324_s26 + $0x88] sm:$0xff]  ;;  %v358_v26 = vld [vmem:[%s1324_s26 + $0x98] sm:$0xff] }
  0x84   : > { %v355_v27 = vld [vmem:[%s1324_s26 + $0x80] sm:$0xff]  ;;  %v357_v28 = vld [vmem:[%s1324_s26 + $0x90] sm:$0xff]  ;;  %v483_v30 = vld [vmem:[%s1337_s1 + $0x88] sm:$0xff]  ;;  %v786_v31 = vpack.c.bf16 %v353_v24, %v351_v23  ;;  %v788_v37 = vpack.c.bf16 %v358_v26, %v356_v25 }
  0x85   : > { %v482_v29 = vld [vmem:[%s1337_s1 + $0x80] sm:$0xff]  ;;  %v360_v32 = vld [vmem:[%s1324_s26 + $0xa8] sm:$0xff]  ;;  %v484_v36 = vld [vmem:[%s1337_s1 + $0x90] sm:$0xff]  ;;  %v790_v47 = vpack.c.bf16 %v357_v28, %v355_v27 }
  0x86   : > { %779 = vmatpush1.bf16.msra.mxu0 %v778_v15  ;;  %v804_v33 = vpack.c.bf16 %v483_v30, %v482_v29  ;;  %v466_v34 = vld [vmem:[%s1337_s1] sm:$0xff]  ;;  %v467_v35 = vld [vmem:[%s1337_s1 + $0x8] sm:$0xff]  ;;  %v485_v39 = vld [vmem:[%s1337_s1 + $0x98] sm:$0xff] }
  0x87   : > { %781 = vmatprep.subr.bf16.mxu0 %v780_v16  ;;  %v806_v38 = vpack.c.bf16 %v467_v35, %v466_v34  ;;  %v468_v40 = vld [vmem:[%s1337_s1 + $0x10] sm:$0xff]  ;;  %v469_v41 = vld [vmem:[%s1337_s1 + $0x18] sm:$0xff]  ;;  %v808_v43 = vpack.c.bf16 %v485_v39, %v484_v36  ;;  %v486_v44 = vld [vmem:[%s1337_s1 + $0xa0] sm:$0xff] }
  0x88   : > { %v362_v42 = vld [vmem:[%s1324_s26 + $0xb8] sm:$0xff]  ;;  %805 = vmatprep.subr.bf16.mxu1 %v804_v33  ;;  %v487_v45 = vld [vmem:[%s1337_s1 + $0xa8] sm:$0xff]  ;;  %v810_v46 = vpack.c.bf16 %v469_v41, %v468_v40  ;;  %v359_v48 = vld [vmem:[%s1324_s26 + $0xa0] sm:$0xff] }
  0x89   : > { %807 = vmatpush3.bf16.msra.mxu1 %v806_v38  ;;  %v812_v49 = vpack.c.bf16 %v487_v45, %v486_v44  ;;  %v470_v50 = vld [vmem:[%s1337_s1 + $0x20] sm:$0xff]  ;;  %v471_v51 = vld [vmem:[%s1337_s1 + $0x28] sm:$0xff]  ;;  %v792_v52 = vpack.c.bf16 %v362_v42, %v360_v32  ;;  %v361_v53 = vld [vmem:[%s1324_s26 + $0xb0] sm:$0xff] }
  0x8a   : > { %783 = vmatpush1.bf16.msra.mxu0 %v782_v21  ;;  %809 = vmatprep.subr.bf16.mxu1 %v808_v43  ;;  %v488_v54 = vld [vmem:[%s1337_s1 + $0xb0] sm:$0xff]  ;;  %v489_v55 = vld [vmem:[%s1337_s1 + $0xb8] sm:$0xff]  ;;  %v364_v56 = vld [vmem:[%s1324_s26 + $0xc8] sm:$0xff]  ;;  %v814_v58 = vpack.c.bf16 %v471_v51, %v470_v50  ;;  %v794_v59 = vpack.c.bf16 %v361_v53, %v359_v48 }
  0x8b   : > { %785 = vmatprep.subr.bf16.mxu0 %v784_v22  ;;  %v366_v57 = vld [vmem:[%s1324_s26 + $0xd8] sm:$0xff]  ;;  %v363_v60 = vld [vmem:[%s1324_s26 + $0xc0] sm:$0xff]  ;;  %v816_v61 = vpack.c.bf16 %v489_v55, %v488_v54  ;;  %v472_v62 = vld [vmem:[%s1337_s1 + $0x30] sm:$0xff] }
  0x8c   : > { %v473_v63 = vld [vmem:[%s1337_s1 + $0x38] sm:$0xff]  ;;  %v796_v0 = vpack.c.bf16 %v366_v57, %v364_v56  ;;  %v365_v1 = vld [vmem:[%s1324_s26 + $0xd0] sm:$0xff]  ;;  %v490_v2 = vld [vmem:[%s1337_s1 + $0xc0] sm:$0xff] }
  0x8d   : > { %811 = vmatpush3.bf16.msra.mxu1 %v810_v46  ;;  %v491_v3 = vld [vmem:[%s1337_s1 + $0xc8] sm:$0xff]  ;;  %v370_v5 = vld [vmem:[%s1324_s26 + $0xf8] sm:$0xff]  ;;  %v818_v6 = vpack.c.bf16 %v473_v63, %v472_v62  ;;  %v798_v7 = vpack.c.bf16 %v365_v1, %v363_v60  ;;  %v367_v9 = vld [vmem:[%s1324_s26 + $0xe0] sm:$0xff] }
  0x8e   : > { %787 = vmatpush1.bf16.msra.mxu0 %v786_v31  ;;  %813 = vmatprep.subr.bf16.mxu1 %v812_v49  ;;  %v368_v4 = vld [vmem:[%s1324_s26 + $0xe8] sm:$0xff]  ;;  %v820_v10 = vpack.c.bf16 %v491_v3, %v490_v2  ;;  %v474_v11 = vld [vmem:[%s1337_s1 + $0x40] sm:$0xff]  ;;  %v369_v14 = vld [vmem:[%s1324_s26 + $0xf0] sm:$0xff] }
  0x8f   : > { %789 = vmatprep.subr.bf16.mxu0 %v788_v37  ;;  %v475_v12 = vld [vmem:[%s1337_s1 + $0x48] sm:$0xff]  ;;  %v800_v13 = vpack.c.bf16 %v370_v5, %v368_v4  ;;  %v492_v15 = vld [vmem:[%s1337_s1 + $0xd0] sm:$0xff]  ;;  %v493_v16 = vld [vmem:[%s1337_s1 + $0xd8] sm:$0xff]  ;;  %v802_v18 = vpack.c.bf16 %v369_v14, %v367_v9  ;;  %v373_v37 = vlaneseq }
  0x90   : > { %v822_v17 = vpack.c.bf16 %v475_v12, %v474_v11  ;;  %v824_v19 = vpack.c.bf16 %v493_v16, %v492_v15  ;;  %v476_v20 = vld [vmem:[%s1337_s1 + $0x50] sm:$0xff]  ;;  %v477_v21 = vld [vmem:[%s1337_s1 + $0x58] sm:$0xff]  ;;  %v494_v22 = vld [vmem:[%s1337_s1 + $0xe0] sm:$0xff] }
  0x91   : > { %815 = vmatpush3.bf16.msra.mxu1 %v814_v58  ;;  %v495_v23 = vld [vmem:[%s1337_s1 + $0xe8] sm:$0xff]  ;;  %v826_v24 = vpack.c.bf16 %v477_v21, %v476_v20  ;;  %v337_v25 = vld [vmem:[#allocation3] sm:$0xff]  ;;  %v338_v27 = vld [vmem:[#allocation3 + $0x8] sm:$0xff]  ;;  %v374_v38 = vshrl.u32 %v373_v37, 7 }
  0x92   : > { %791 = vmatpush1.bf16.msra.mxu0 %v790_v47  ;;  %817 = vmatprep.subr.bf16.mxu1 %v816_v61  ;;  %v828_v26 = vpack.c.bf16 %v495_v23, %v494_v22  ;;  %v478_v28 = vld [vmem:[%s1337_s1 + $0x60] sm:$0xff]  ;;  %v479_v29 = vld [vmem:[%s1337_s1 + $0x68] sm:$0xff]  ;;  %v496_v31 = vld [vmem:[%s1337_s1 + $0xf0] sm:$0xff] }
  0x93   : > { %793 = vmatprep.subr.bf16.mxu0 %v792_v52  ;;  %v830_v30 = vpack.c.bf16 %v479_v29, %v478_v28  ;;  %v497_v32 = vld [vmem:[%s1337_s1 + $0xf8] sm:$0xff]  ;;  %v480_v34 = vld [vmem:[%s1337_s1 + $0x70] sm:$0xff]  ;;  %v375_v39 = vsub.s32 0, %v374_v38  ;;  %v379_v40 = vsub.s32 1, %v374_v38  ;;  %v464_v56 = vld [vmem:[#allocation2] sm:$0xff] }
  0x94   : > { %v832_v33 = vpack.c.bf16 %v497_v32, %v496_v31  ;;  %v481_v35 = vld [vmem:[%s1337_s1 + $0x78] sm:$0xff]  ;;  %v465_v61 = vld [vmem:[#allocation2 + $0x8] sm:$0xff]  ;;  %v727_v2 = vld [vmem:[%s1460_s4] ss:$0 sm:$0xff] (!%p726_p5) }
  0x95   : > { %819 = vmatpush3.bf16.msra.mxu1 %v818_v6  ;;  %v834_v36 = vpack.c.bf16 %v481_v35, %v480_v34 }
  0x96   : > { %795 = vmatpush1.bf16.msra.mxu0 %v794_v59  ;;  %821 = vmatprep.subr.bf16.mxu1 %v820_v10 }
  0x97   : > { %797 = vmatprep.subr.bf16.mxu0 %v796_v0 }
  0x99   : > { %823 = vmatpush3.bf16.msra.mxu1 %v822_v17 }
  0x9a   : > { %799 = vmatpush1.bf16.msra.mxu0 %v798_v7  ;;  %825 = vmatprep.subr.bf16.mxu1 %v824_v19 }
  0x9b   : > { %801 = vmatprep.subr.bf16.mxu0 %v800_v13 }
  0x9d   : > { %827 = vmatpush3.bf16.msra.mxu1 %v826_v24 }
  0x9e   : > { %803 = vmatpush1.bf16.msra.mxu0 %v802_v18  ;;  %829 = vmatprep.subr.bf16.mxu1 %v828_v26 }
  0xa1   : > { %448 = vmatmul.mubr.f32.vlgmr.msra.gmra.mrb[0].mxu0 %v337_v25  ;;  %831 = vmatpush3.bf16.msra.mxu1 %v830_v30 }
  0xa2   : > { %453 = vmatprep.mubr.f32.mxu0 %v1106_v8  ;;  %833 = vmatprep.subr.bf16.mxu1 %v832_v33  ;;  %v371_v8 = vld [vmem:[%s327_s7] sm:$0x3] }
  0xa3   : > { %v376_v41 = vrot.slane %v371_v8, %v375_v39  ;;  %v380_v42 = vrot.slane %v371_v8, %v379_v40 }
  0xa5   : > { %454 = vmatmul.mubr.f32.gmra.mrb[2].mxu0 %v338_v27  ;;  %835 = vmatpush3.bf16.msra.mxu1 %v834_v36 }
 0x174   : > { %v449_v43 = vpop.f32.mrb[0].mxu0 }
 0x175   : > { %v450_v44 = vadd.f32 %v449_v43, %v376_v41  ;;  %v451_v45 = vpop.f32.mrb[1].mxu0 }
 0x176   : > { %v452_v46 = vadd.f32 %v451_v45, %v380_v42 }
 0x177   : > { %v460_v49 = vmax.f32 %v450_v44, 0.0 }
 0x178   : > { %v455_v47 = vpop.f32.mrb[2].mxu0  ;;  %v461_v48 = vmax.f32 %v452_v46, 0.0 }
 0x179   : > { %v456_v50 = vadd.f32 %v455_v47, %v376_v41  ;;  %v457_v51 = vpop.f32.mrb[3].mxu0 }
 0x17a   : > { %v458_v52 = vadd.f32 %v457_v51, %v380_v42  ;;  %562 = vmatprep.mubr.f32.mxu1 %v461_v48 }
 0x17b   : > { %563 = vmatmul.mubr.f32.vlgmr.msra.gmra.mrb[0].mxu1 %v460_v49  ;;  %v462_v54 = vmax.f32 %v456_v50, 0.0 }
 0x17c   : > { %v463_v53 = vmax.f32 %v458_v52, 0.0 }
 0x17e   : > { %567 = vmatprep.mubr.f32.mxu1 %v463_v53 }
 0x17f   : > { %568 = vmatmul.mubr.f32.gmra.mrb[2].mxu1 %v462_v54 }
 0x24e   : > { %v766_v55 = vpop.f32.mrb[0].mxu1 }
 0x24f   : > { %v767_v57 = vpop.f32.mrb[1].mxu1 }
 0x250   : > { %v768_v58 = vadd.f32 %v767_v57, %v766_v55 }
 0x252   : > { %v573_v59 = vadd.f32 %v768_v58, %v464_v56  ;;  %v769_v60 = vpop.f32.mrb[2].mxu1  ;;  %580 = sbr.rel (%p726_p5) target bundleno = 611 (0x263), region = 60 }
 0x253   : > { %v770_v62 = vpop.f32.mrb[3].mxu1 }
 0x254   : > { %575 = vst [vmem:[#allocation2] sm:$0xff] %v573_v59  ;;  %v771_v63 = vadd.f32 %v770_v62, %v769_v60 }
 0x256   : > { %v574_v0 = vadd.f32 %v771_v63, %v465_v61 }
 0x258   : > { %576 = vst [vmem:[#allocation2 + $0x8] sm:$0xff] %v574_v0 }
 0x25b   : > { %v581_v1 = vld [vmem:[#allocation2] sm:$0xff] }
 0x25c   : > { %v590_v4 = vadd.f32 %v727_v2, %v581_v1 }
 0x25e   : > { %592 = vst [vmem:[#allocation9] sm:$0xff] %v590_v4 }
 0x25f   : > { %v582_v3 = vld [vmem:[#allocation2 + $0x8] sm:$0xff] }
 0x260   : > { %v591_v5 = vadd.f32 %v727_v2, %v582_v3 }
 0x262   : > { %593 = vst [vmem:[#allocation9 + $0x8] sm:$0xff] %v591_v5 }
 0x263 PF: > { %p862_p1 = scmp.eq.s32.totalorder %s1229_s15, 1  ;;  %s1107_s12 = smov [#allocation9]  }
 0x264   : > { %s603_s25 = sshll.u32 %s1107_s12, 4  ;;  %s604_s25 = int_to_ptr.vmem [resolvable:$true] %s603_s25 }
 0x265   : > { %s1011_s29 = scalar_lea.vmem %s604_s25, 256  ;;  %p1018_p2 = scmp.lt.s32.totalorder %s604_s25, %s604_s25 }
 0x266   : > { %p1012_p4 = scmp.ne.s32.totalorder %s604_s25, %s1011_s29  ;;  %p1019_p7 = scmp.lt.s32.totalorder %s1011_s29, %s1011_s29 }
 0x268   : > { %p1013_p8 = pnand %p1012_p4, %p862_p1  ;;  %p1020_p9 = por %p1019_p7, %p1018_p2 }
 0x26a   : > { %p1014_p13 = pneg %p1013_p8 }
 0x26c   : > { %p1021_p3 = pnand %p1020_p9, %p1014_p13 }
 0x26e   : > { %1024 = shalt.err (!%p1021_p3)
}
 0x26f   : > { %s1025_s10 = scalar_lea.hbm %s1461_s5, 256 }
 0x270   : > { %p1026_p11 = scmp.ne.s32.totalorder %s1461_s5, %s1025_s10  ;;  %p1031_p6 = scmp.lt.u32.totalorder %s1025_s10, %s1461_s5 }
 0x272   : > { %p1027_p12 = pnand %p1026_p11, %p862_p1 }
 0x274   : > { %p1028_p10 = pneg %p1027_p12 }
 0x276   : > { %p1033_p0 = pnand %p1031_p6, %p1028_p10 }
 0x278   : > { %1036 = shalt.err (!%p1033_p0)
}
 0x279   : > { %s1108_s13 = smov 128   ;;  %s1109_s17 = smov 8  }
 0x27a   : > { %845 = dma.vmem_to_hbm [thread:$0]  (%p862_p1), %s604_s25, 256, %s1461_s5, [#allocation5], %s1108_s13, %s1108_s13, %s1109_s17  }
 0x27b   : > { %1070 = dma.done.wait (%p862_p1), [#allocation5], 256  }
 0x27c   : > { %1072 = vsyncadd (%p862_p1), [#allocation5], 4294967040 }
 0x27d PF: > { %s20_s23 = sadd.s32 1, %s1095_s23   ;;  %s1481_s18 = smov %s1079_s19 }
 0x27e   : > { %p17_p5 = scmp.ge.s32.totalorder %s20_s23, 4   ;;  %s1482_s19 = smov %s1083_s20 }
 0x27f   : > { %s1483_s20 = smov %s1184_s30  ;;  %s1484_s21 = smov %s1091_s22 }
 0x280   : > { %s1485_s22 = smov %s1487_s24  ;;  %19 = sbr.rel (!%p17_p5) target bundleno = 8 (0x8), region = 106 }
 0x287   :  { %619 = vsyncpa [#allocation4], 1 }
 0x288   :  { %621 = vsyncpa [#allocation4 + $0x1], 1 }
 0x289   :  { %622 = vsyncpa [#allocation7], 1 }
 0x28a   :  { %624 = vsyncpa [#allocation7 + $0x1], 1 }
 0x28b   :  { %625 = vsyncpa [#allocation5], 1 }
 0x28c   :  { %627 = vsyncpa [#allocation5 + $0x1], 1 }

</bundles_post_ra>
